<compile_context>
chip_gen: v6e
topology: v6e:2x2x1
jax: 0.10.0
libtpu: 0.0.40
codegen_flags: <defaults>
</compile_context>

<pallas_src>
import numpy as np
import jax
import jax.numpy as jnp
from jax.experimental import pallas as pl
from jax.experimental.pallas import tpu as pltpu


# ----------------------------------------------------------------------------
# Fused Pallas kernel: 1x1 conv -> separable bilinear resize -> scaled mean CE
# ----------------------------------------------------------------------------
def _deep_supervision_scale_kernel(x_ref, w_ref, b_ref, rh_ref, rwt_ref,
                                   tgt_ref, scale_ref, out_ref, loss_ref):
    """One selected scale, whole batch in a single invocation.

    x_ref     (N, Cin, H, W)        VMEM  backbone intermediate
    w_ref     (Cout, Cin)           SMEM  1x1-conv weight (scalar reads)
    b_ref     (Cout,)               SMEM  1x1-conv bias
    rh_ref    (Hout, H)             VMEM  bilinear row-resize matrix
    rwt_ref   (W, Wout)             VMEM  bilinear col-resize matrix (transposed)
    tgt_ref   (N, Hout, Wout)       VMEM  int32 class indices
    scale_ref (1,)                  SMEM  loss scaling (adaptive weight)
    out_ref   (N, Cout, Hout, Wout) VMEM  resized logits (module "output")
    loss_ref  (1, 1)                VMEM  weight * mean pixel cross-entropy
    """
    n_batch, c_in = x_ref.shape[0], x_ref.shape[1]
    c_out = w_ref.shape[0]
    h_out, w_out = tgt_ref.shape[1], tgt_ref.shape[2]
    inv_npx = 1.0 / float(n_batch * h_out * w_out)

    total = jnp.zeros((1, 1), jnp.float32)
    for ni in range(n_batch):                      # static unroll (N is tiny)
        tgt = tgt_ref[ni]                          # (Hout, Wout) int32
        logits = []
        for oi in range(c_out):
            # --- 1x1 conv on the VPU: unrolled MAC over Cin (Cin <= 8) -----
            y = w_ref[oi, 0] * x_ref[ni, 0]
            for ci in range(1, c_in):
                y = y + w_ref[oi, ci] * x_ref[ni, ci]          # (H, W) f32
            # --- separable bilinear resize: rows (H->Hout) then cols -------
            t = jnp.dot(rh_ref[...], y, preferred_element_type=jnp.float32)
            z = jnp.dot(t, rwt_ref[...], preferred_element_type=jnp.float32)
            # bilinear rows sum to 1 -> the conv bias commutes with resize.
            z = z + b_ref[oi]                                  # (Hout, Wout)
            out_ref[ni, oi] = z.astype(out_ref.dtype)
            logits.append(z)

        # --- pixel-wise cross-entropy over the class axis (no one-hot) -----
        # TODO(synk): PyTorch CrossEntropyLoss ignore_index (-100) handling is
        # not implemented; targets are assumed to be valid class indices.
        m = logits[0]
        for z in logits[1:]:
            m = jnp.maximum(m, z)
        sexp = jnp.exp(logits[0] - m)
        for z in logits[1:]:
            sexp = sexp + jnp.exp(z - m)
        lse = jnp.log(sexp) + m                                # (Hout, Wout)
        picked = jnp.where(tgt == 0, logits[0], 0.0)
        for oi in range(1, c_out):
            picked = picked + jnp.where(tgt == oi, logits[oi], 0.0)
        nll = lse - picked
        total = total + jnp.sum(jnp.sum(nll, axis=1, keepdims=True),
                                axis=0, keepdims=True)

    loss_ref[...] = total * (scale_ref[0] * inv_npx)


def fused_scale_forward(o, w, b, rh, rwt, tgt, weight):
    """o: (N,Cin,H,W); w: (Cout,Cin); b: (Cout,1); rh: (Hout,H); rwt: (W,Wout);
    tgt: (N,Hout,Wout) int32; weight: python float loss scaling."""
    N, Cin, H, W = o.shape
    Cout = w.shape[0]
    Hout, Wout = int(tgt.shape[1]), int(tgt.shape[2])
    vmem = pltpu.MemorySpace.VMEM
    smem = pltpu.MemorySpace.SMEM
    # Single invocation (no grid): whole batch at once; at these sizes launch
    # and DMA overhead dominate, so one call per scale is the right shape.
    # TODO(synk): for large Hout*Wout, tile the spatial axis with a grid marked
    # "parallel" (uses v7x's 2 TensorCores) and cast MXU operands to bf16.
    logits, loss = pl.pallas_call(
        _deep_supervision_scale_kernel,
        out_shape=(jax.ShapeDtypeStruct((N, Cout, Hout, Wout), jnp.float32),
                   jax.ShapeDtypeStruct((1, 1), jnp.float32)),
        in_specs=[
            pl.BlockSpec(memory_space=vmem),   # x
            pl.BlockSpec(memory_space=smem),   # conv weight (scalars)
            pl.BlockSpec(memory_space=smem),   # conv bias (scalars)
            pl.BlockSpec(memory_space=vmem),   # Rh
            pl.BlockSpec(memory_space=vmem),   # Rw^T
            pl.BlockSpec(memory_space=vmem),   # target indices
            pl.BlockSpec(memory_space=smem),   # loss scaling
        ],
        out_specs=(pl.BlockSpec(memory_space=vmem),
                   pl.BlockSpec(memory_space=vmem)),
    )(o.astype(jnp.float32),
      w.astype(jnp.float32),
      b.reshape(-1).astype(jnp.float32),
      rh, rwt,
      tgt.astype(jnp.int32),
      jnp.full((1,), weight, jnp.float32))
    return logits, loss[0, 0]


# ----------------------------------------------------------------------------
# Glue: bilinear resize matrices (PyTorch align_corners=False semantics)
# ----------------------------------------------------------------------------
def bilinear_matrix(in_size, out_size):
    scale = in_size / out_size
    o = np.arange(out_size, dtype=np.float64)
    src = np.maximum((o + 0.5) * scale - 0.5, 0.0)
    i0 = np.minimum(np.floor(src).astype(np.int64), in_size - 1)
    i1 = np.minimum(i0 + 1, in_size - 1)
    f = src - i0
    R = np.zeros((out_size, in_size), np.float32)
    R[np.arange(out_size), i0] += (1.0 - f).astype(np.float32)
    R[np.arange(out_size), i1] += f.astype(np.float32)
    return R


def full_resize_matrix(H, W, Hout, Wout):
    # Only used by the pure-JAX reference.
    Rh = bilinear_matrix(H, Hout)            # (Hout, H)
    Rw = bilinear_matrix(W, Wout)            # (Wout, W)
    return jnp.asarray(np.kron(Rh, Rw).T)    # (H*W, Hout*Wout)


# ----------------------------------------------------------------------------
# Glue: select / weighting functions (ported from the PyTorch source)
# ----------------------------------------------------------------------------
def select_third_to_last_skip_before_last(s):
    assert len(s) >= 4
    return list(s[1:-2]) + [s[-2]]


def adaptative_weighting(outputs):
    elements = np.asarray([np.prod(o.shape[2:]) for o in outputs], dtype=np.float32)
    return elements / elements.max()


# ----------------------------------------------------------------------------
# Glue: tiny deterministic synthetic backbone (external module in PyTorch)
# ----------------------------------------------------------------------------
def _avg_pool2(x):
    N, C, H, W = x.shape
    return x.reshape(N, C, H // 2, 2, W // 2, 2).mean(axis=(3, 5))


def backbone_forward_with_intermediate(x, mixes):
    mix1, mix2, mix_out = mixes
    o0 = x                                                    # (N, 3, 16, 16)
    o1 = jnp.einsum('oc,nchw->nohw', mix1, _avg_pool2(x))     # (N, 4,  8,  8)
    o2 = jnp.einsum('oc,nchw->nohw', mix2, _avg_pool2(o1))    # (N, 8,  4,  4)
    o3 = jnp.einsum('oc,nchw->nohw', mix_out, x)              # (N, 2, 16, 16)
    return [o0, o1, o2, o3]


# ----------------------------------------------------------------------------
# DeepSupervision forward (Pallas-backed)
# ----------------------------------------------------------------------------
def deep_supervision_forward(x, target, conv_params, mixes):
    os_ = backbone_forward_with_intermediate(x, mixes)
    seq = select_third_to_last_skip_before_last(os_)
    weights = adaptative_weighting(seq)
    N = x.shape[0]
    Hout, Wout = int(target.shape[2]), int(target.shape[3])
    tgt = target.reshape(N, Hout, Wout).astype(jnp.int32)

    outputs = []
    for n, o in enumerate(seq):
        w, b = conv_params[n]                      # w: (Cout, Cin), b: (Cout, 1)
        _, Cin, H, W = o.shape
        rh = jnp.asarray(bilinear_matrix(H, Hout))        # (Hout, H)
        rwt = jnp.asarray(bilinear_matrix(W, Wout).T)     # (W, Wout)
        logits, loss = fused_scale_forward(o, w, b, rh, rwt, tgt, float(weights[n]))
        # TODO(synk): trw's `OutputSegmentation` Output object is external; it
        # is represented here as a dict with resized logits + scaled mean CE.
        outputs.append({
            "output": logits,                      # (N, Cout, Hout, Wout)
            "loss": loss,
            "loss_scaling": float(weights[n]),
        })
    return outputs


# ----------------------------------------------------------------------------
# Pure-JAX reference for correctness checking
# ----------------------------------------------------------------------------
def reference_forward(x, target, conv_params, mixes):
    os_ = backbone_forward_with_intermediate(x, mixes)
    seq = select_third_to_last_skip_before_last(os_)
    weights = adaptative_weighting(seq)
    N = x.shape[0]
    Hout, Wout = int(target.shape[2]), int(target.shape[3])
    S = Hout * Wout
    tgt_flat = target.reshape(N, S).astype(jnp.int32)

    outs = []
    for n, o in enumerate(seq):
        w, b = conv_params[n]
        Cout = w.shape[0]
        _, Cin, H, W = o.shape
        y = jnp.einsum('oc,nchw->nohw', w, o) + b.reshape(1, Cout, 1, 1)
        rfull = full_resize_matrix(H, W, Hout, Wout)
        logits = jnp.einsum('ncp,ps->ncs', y.reshape(N, Cout, H * W), rfull)
        logp = jax.nn.log_softmax(logits, axis=1)
        onehot = jax.nn.one_hot(tgt_flat, Cout, axis=1, dtype=jnp.float32)
        ce = -jnp.mean(jnp.sum(onehot * logp, axis=1))
        outs.append({"output": logits.reshape(N, Cout, Hout, Wout),
                     "loss": weights[n] * ce})
    return outs


# ----------------------------------------------------------------------------
if __name__ == "__main__":
    key = jax.random.PRNGKey(0)
    ks = jax.random.split(key, 10)

    # Inputs (PyTorch convention: NCHW image, N1HW integer target)
    N, Cin_img, Himg, Wimg = 2, 3, 16, 16
    num_classes = 2
    x = jax.random.normal(ks[0], (N, Cin_img, Himg, Wimg), dtype=jnp.float32)
    target = jax.random.randint(ks[1], (N, 1, Himg, Wimg), 0, num_classes, dtype=jnp.int32)

    # Synthetic backbone channel-mixing matrices (deterministic)
    mixes = (
        0.3 * jax.random.normal(ks[2], (4, 3), dtype=jnp.float32),
        0.3 * jax.random.normal(ks[3], (8, 4), dtype=jnp.float32),
        0.3 * jax.random.normal(ks[4], (2, 3), dtype=jnp.float32),
    )

    # DeepSupervision 1x1-conv output blocks (no norm / no activation):
    # selected intermediates are o1 (4ch, 8x8) and o2 (8ch, 4x4) -> 2 classes.
    conv_params = [
        (0.2 * jax.random.normal(ks[5], (num_classes, 4), dtype=jnp.float32),
         0.1 * jax.random.normal(ks[6], (num_classes, 1), dtype=jnp.float32)),
        (0.2 * jax.random.normal(ks[7], (num_classes, 8), dtype=jnp.float32),
         0.1 * jax.random.normal(ks[8], (num_classes, 1), dtype=jnp.float32)),
    ]

    outs = deep_supervision_forward(x, target, conv_params, mixes)
    outs = jax.block_until_ready(outs)

    refs = reference_forward(x, target, conv_params, mixes)
    refs = jax.block_until_ready(refs)

    for got, ref in zip(outs, refs):
        np.testing.assert_allclose(np.asarray(got["output"]),
                                   np.asarray(ref["output"]),
                                   rtol=1e-5, atol=1e-5)
        np.testing.assert_allclose(np.asarray(got["loss"]),
                                   np.asarray(ref["loss"]),
                                   rtol=1e-5, atol=1e-5)

    print("KERNEL_OK")
</pallas_src>

<mosaic_0001>
module attributes {stable_mosaic.version = 11 : i64} {
  func.func @_deep_supervision_scale_kernel(%arg0: memref<2x4x8x8xf32, #tpu.memory_space<vmem>>, %arg1: memref<2x4xf32, #tpu.memory_space<smem>>, %arg2: memref<2xf32, #tpu.memory_space<smem>>, %arg3: memref<16x8xf32, #tpu.memory_space<vmem>>, %arg4: memref<8x16xf32, #tpu.memory_space<vmem>>, %arg5: memref<2x16x16xi32, #tpu.memory_space<vmem>>, %arg6: memref<1xf32, #tpu.memory_space<smem>>, %arg7: memref<2x2x16x16xf32, #tpu.memory_space<vmem>>, %arg8: memref<1x1xf32, #tpu.memory_space<vmem>>) attributes {dimension_semantics = [], scalar_prefetch = 0 : i64, scratch_operands = 0 : i64, tpu.core_type = #tpu.core_type<tc>} {
    %cst = arith.constant 0.000000e+00 : f32
    %0 = vector.broadcast %cst : f32 to vector<1x1xf32>
    %c0 = arith.constant 0 : index
    %c0_0 = arith.constant 0 : index
    %c0_1 = arith.constant 0 : index
    %1 = vector.load %arg5[%c0, %c0_0, %c0_1] : memref<2x16x16xi32, #tpu.memory_space<vmem>>, vector<1x16x16xi32>
    %2 = vector.shape_cast %1 : vector<1x16x16xi32> to vector<16x16xi32>
    %c0_2 = arith.constant 0 : index
    %c0_3 = arith.constant 0 : index
    %3 = memref.load %arg1[%c0_2, %c0_3] : memref<2x4xf32, #tpu.memory_space<smem>>
    %c0_4 = arith.constant 0 : index
    %c0_5 = arith.constant 0 : index
    %c0_6 = arith.constant 0 : index
    %c0_7 = arith.constant 0 : index
    %4 = vector.load %arg0[%c0_4, %c0_5, %c0_6, %c0_7] : memref<2x4x8x8xf32, #tpu.memory_space<vmem>>, vector<1x1x8x8xf32>
    %5 = vector.shape_cast %4 : vector<1x1x8x8xf32> to vector<8x8xf32>
    %6 = vector.broadcast %3 : f32 to vector<8x8xf32>
    %7 = arith.mulf %6, %5 : vector<8x8xf32>
    %c0_8 = arith.constant 0 : index
    %c1 = arith.constant 1 : index
    %8 = memref.load %arg1[%c0_8, %c1] : memref<2x4xf32, #tpu.memory_space<smem>>
    %c0_9 = arith.constant 0 : index
    %c1_10 = arith.constant 1 : index
    %c0_11 = arith.constant 0 : index
    %c0_12 = arith.constant 0 : index
    %9 = vector.load %arg0[%c0_9, %c1_10, %c0_11, %c0_12] : memref<2x4x8x8xf32, #tpu.memory_space<vmem>>, vector<1x1x8x8xf32>
    %10 = vector.shape_cast %9 : vector<1x1x8x8xf32> to vector<8x8xf32>
    %11 = vector.broadcast %8 : f32 to vector<8x8xf32>
    %12 = arith.mulf %11, %10 : vector<8x8xf32>
    %13 = arith.addf %7, %12 : vector<8x8xf32>
    %c0_13 = arith.constant 0 : index
    %c2 = arith.constant 2 : index
    %14 = memref.load %arg1[%c0_13, %c2] : memref<2x4xf32, #tpu.memory_space<smem>>
    %c0_14 = arith.constant 0 : index
    %c2_15 = arith.constant 2 : index
    %c0_16 = arith.constant 0 : index
    %c0_17 = arith.constant 0 : index
    %15 = vector.load %arg0[%c0_14, %c2_15, %c0_16, %c0_17] : memref<2x4x8x8xf32, #tpu.memory_space<vmem>>, vector<1x1x8x8xf32>
    %16 = vector.shape_cast %15 : vector<1x1x8x8xf32> to vector<8x8xf32>
    %17 = vector.broadcast %14 : f32 to vector<8x8xf32>
    %18 = arith.mulf %17, %16 : vector<8x8xf32>
    %19 = arith.addf %13, %18 : vector<8x8xf32>
    %c0_18 = arith.constant 0 : index
    %c3 = arith.constant 3 : index
    %20 = memref.load %arg1[%c0_18, %c3] : memref<2x4xf32, #tpu.memory_space<smem>>
    %c0_19 = arith.constant 0 : index
    %c3_20 = arith.constant 3 : index
    %c0_21 = arith.constant 0 : index
    %c0_22 = arith.constant 0 : index
    %21 = vector.load %arg0[%c0_19, %c3_20, %c0_21, %c0_22] : memref<2x4x8x8xf32, #tpu.memory_space<vmem>>, vector<1x1x8x8xf32>
    %22 = vector.shape_cast %21 : vector<1x1x8x8xf32> to vector<8x8xf32>
    %23 = vector.broadcast %20 : f32 to vector<8x8xf32>
    %24 = arith.mulf %23, %22 : vector<8x8xf32>
    %25 = arith.addf %19, %24 : vector<8x8xf32>
    %c0_23 = arith.constant 0 : index
    %c0_24 = arith.constant 0 : index
    %26 = vector.load %arg3[%c0_23, %c0_24] : memref<16x8xf32, #tpu.memory_space<vmem>>, vector<16x8xf32>
    %cst_25 = arith.constant dense<0.000000e+00> : vector<16x8xf32>
    %27 = tpu.matmul %26, %25, %cst_25 {dimension_numbers = #tpu.dot_dimension_numbers<[1], [0], [0], [1], [0, 0, 1, 1], [], []>} : vector<16x8xf32>, vector<8x8xf32>, vector<16x8xf32> -> vector<16x8xf32>
    %c0_26 = arith.constant 0 : index
    %c0_27 = arith.constant 0 : index
    %28 = vector.load %arg4[%c0_26, %c0_27] : memref<8x16xf32, #tpu.memory_space<vmem>>, vector<8x16xf32>
    %cst_28 = arith.constant dense<0.000000e+00> : vector<16x16xf32>
    %29 = tpu.matmul %27, %28, %cst_28 {dimension_numbers = #tpu.dot_dimension_numbers<[1], [0], [0], [1], [0, 0, 1, 1], [], []>} : vector<16x8xf32>, vector<8x16xf32>, vector<16x16xf32> -> vector<16x16xf32>
    %c0_29 = arith.constant 0 : index
    %30 = memref.load %arg2[%c0_29] : memref<2xf32, #tpu.memory_space<smem>>
    %31 = vector.broadcast %30 : f32 to vector<16x16xf32>
    %32 = arith.addf %29, %31 : vector<16x16xf32>
    %c0_30 = arith.constant 0 : index
    %c0_31 = arith.constant 0 : index
    %c0_32 = arith.constant 0 : index
    %c0_33 = arith.constant 0 : index
    %33 = vector.load %arg7[%c0_30, %c0_31, %c0_32, %c0_33] : memref<2x2x16x16xf32, #tpu.memory_space<vmem>>, vector<1x1x16x16xf32>
    %34 = vector.shape_cast %33 : vector<1x1x16x16xf32> to vector<16x16xf32>
    %35 = vector.shape_cast %32 : vector<16x16xf32> to vector<1x1x16x16xf32>
    tpu.vector_store %arg7[%c0_30, %c0_31, %c0_32, %c0_33], %35 {strides = array<i32>} : memref<2x2x16x16xf32, #tpu.memory_space<vmem>>, vector<1x1x16x16xf32>,
    %c1_34 = arith.constant 1 : index
    %c0_35 = arith.constant 0 : index
    %36 = memref.load %arg1[%c1_34, %c0_35] : memref<2x4xf32, #tpu.memory_space<smem>>
    %c0_36 = arith.constant 0 : index
    %c0_37 = arith.constant 0 : index
    %c0_38 = arith.constant 0 : index
    %c0_39 = arith.constant 0 : index
    %37 = vector.load %arg0[%c0_36, %c0_37, %c0_38, %c0_39] : memref<2x4x8x8xf32, #tpu.memory_space<vmem>>, vector<1x1x8x8xf32>
    %38 = vector.shape_cast %37 : vector<1x1x8x8xf32> to vector<8x8xf32>
    %39 = vector.broadcast %36 : f32 to vector<8x8xf32>
    %40 = arith.mulf %39, %38 : vector<8x8xf32>
    %c1_40 = arith.constant 1 : index
    %c1_41 = arith.constant 1 : index
    %41 = memref.load %arg1[%c1_40, %c1_41] : memref<2x4xf32, #tpu.memory_space<smem>>
    %c0_42 = arith.constant 0 : index
    %c1_43 = arith.constant 1 : index
    %c0_44 = arith.constant 0 : index
    %c0_45 = arith.constant 0 : index
    %42 = vector.load %arg0[%c0_42, %c1_43, %c0_44, %c0_45] : memref<2x4x8x8xf32, #tpu.memory_space<vmem>>, vector<1x1x8x8xf32>
    %43 = vector.shape_cast %42 : vector<1x1x8x8xf32> to vector<8x8xf32>
    %44 = vector.broadcast %41 : f32 to vector<8x8xf32>
    %45 = arith.mulf %44, %43 : vector<8x8xf32>
    %46 = arith.addf %40, %45 : vector<8x8xf32>
    %c1_46 = arith.constant 1 : index
    %c2_47 = arith.constant 2 : index
    %47 = memref.load %arg1[%c1_46, %c2_47] : memref<2x4xf32, #tpu.memory_space<smem>>
    %c0_48 = arith.constant 0 : index
    %c2_49 = arith.constant 2 : index
    %c0_50 = arith.constant 0 : index
    %c0_51 = arith.constant 0 : index
    %48 = vector.load %arg0[%c0_48, %c2_49, %c0_50, %c0_51] : memref<2x4x8x8xf32, #tpu.memory_space<vmem>>, vector<1x1x8x8xf32>
    %49 = vector.shape_cast %48 : vector<1x1x8x8xf32> to vector<8x8xf32>
    %50 = vector.broadcast %47 : f32 to vector<8x8xf32>
    %51 = arith.mulf %50, %49 : vector<8x8xf32>
    %52 = arith.addf %46, %51 : vector<8x8xf32>
    %c1_52 = arith.constant 1 : index
    %c3_53 = arith.constant 3 : index
    %53 = memref.load %arg1[%c1_52, %c3_53] : memref<2x4xf32, #tpu.memory_space<smem>>
    %c0_54 = arith.constant 0 : index
    %c3_55 = arith.constant 3 : index
    %c0_56 = arith.constant 0 : index
    %c0_57 = arith.constant 0 : index
    %54 = vector.load %arg0[%c0_54, %c3_55, %c0_56, %c0_57] : memref<2x4x8x8xf32, #tpu.memory_space<vmem>>, vector<1x1x8x8xf32>
    %55 = vector.shape_cast %54 : vector<1x1x8x8xf32> to vector<8x8xf32>
    %56 = vector.broadcast %53 : f32 to vector<8x8xf32>
    %57 = arith.mulf %56, %55 : vector<8x8xf32>
    %58 = arith.addf %52, %57 : vector<8x8xf32>
    %c0_58 = arith.constant 0 : index
    %c0_59 = arith.constant 0 : index
    %59 = vector.load %arg3[%c0_58, %c0_59] : memref<16x8xf32, #tpu.memory_space<vmem>>, vector<16x8xf32>
    %cst_60 = arith.constant dense<0.000000e+00> : vector<16x8xf32>
    %60 = tpu.matmul %59, %58, %cst_60 {dimension_numbers = #tpu.dot_dimension_numbers<[1], [0], [0], [1], [0, 0, 1, 1], [], []>} : vector<16x8xf32>, vector<8x8xf32>, vector<16x8xf32> -> vector<16x8xf32>
    %c0_61 = arith.constant 0 : index
    %c0_62 = arith.constant 0 : index
    %61 = vector.load %arg4[%c0_61, %c0_62] : memref<8x16xf32, #tpu.memory_space<vmem>>, vector<8x16xf32>
    %cst_63 = arith.constant dense<0.000000e+00> : vector<16x16xf32>
    %62 = tpu.matmul %60, %61, %cst_63 {dimension_numbers = #tpu.dot_dimension_numbers<[1], [0], [0], [1], [0, 0, 1, 1], [], []>} : vector<16x8xf32>, vector<8x16xf32>, vector<16x16xf32> -> vector<16x16xf32>
    %c1_64 = arith.constant 1 : index
    %63 = memref.load %arg2[%c1_64] : memref<2xf32, #tpu.memory_space<smem>>
    %64 = vector.broadcast %63 : f32 to vector<16x16xf32>
    %65 = arith.addf %62, %64 : vector<16x16xf32>
    %c0_65 = arith.constant 0 : index
    %c1_66 = arith.constant 1 : index
    %c0_67 = arith.constant 0 : index
    %c0_68 = arith.constant 0 : index
    %66 = vector.load %arg7[%c0_65, %c1_66, %c0_67, %c0_68] : memref<2x2x16x16xf32, #tpu.memory_space<vmem>>, vector<1x1x16x16xf32>
    %67 = vector.shape_cast %66 : vector<1x1x16x16xf32> to vector<16x16xf32>
    %68 = vector.shape_cast %65 : vector<16x16xf32> to vector<1x1x16x16xf32>
    tpu.vector_store %arg7[%c0_65, %c1_66, %c0_67, %c0_68], %68 {strides = array<i32>} : memref<2x2x16x16xf32, #tpu.memory_space<vmem>>, vector<1x1x16x16xf32>,
    %69 = arith.maximumf %32, %65 : vector<16x16xf32>
    %70 = arith.subf %32, %69 : vector<16x16xf32>
    %71 = math.exp %70 : vector<16x16xf32>
    %72 = arith.subf %65, %69 : vector<16x16xf32>
    %73 = math.exp %72 : vector<16x16xf32>
    %74 = arith.addf %71, %73 : vector<16x16xf32>
    %75 = math.log %74 : vector<16x16xf32>
    %76 = arith.addf %75, %69 : vector<16x16xf32>
    %c0_i32 = arith.constant 0 : i32
    %77 = vector.broadcast %c0_i32 : i32 to vector<16x16xi32>
    %78 = arith.cmpi eq, %2, %77 : vector<16x16xi32>
    %cst_69 = arith.constant 0.000000e+00 : f32
    %79 = vector.broadcast %cst_69 : f32 to vector<16x16xf32>
    %80 = arith.select %78, %32, %79 : vector<16x16xi1>, vector<16x16xf32>
    %c1_i32 = arith.constant 1 : i32
    %81 = vector.broadcast %c1_i32 : i32 to vector<16x16xi32>
    %82 = arith.cmpi eq, %2, %81 : vector<16x16xi32>
    %cst_70 = arith.constant 0.000000e+00 : f32
    %83 = vector.broadcast %cst_70 : f32 to vector<16x16xf32>
    %84 = arith.select %82, %65, %83 : vector<16x16xi1>, vector<16x16xf32>
    %85 = arith.addf %80, %84 : vector<16x16xf32>
    %86 = arith.subf %76, %85 : vector<16x16xf32>
    %cst_71 = arith.constant dense<0.000000e+00> : vector<16xf32>
    %87 = vector.multi_reduction <add>, %86, %cst_71 [1] : vector<16x16xf32> to vector<16xf32>
    %88 = vector.shape_cast %87 : vector<16xf32> to vector<16x1xf32>
    %cst_72 = arith.constant dense<0.000000e+00> : vector<1xf32>
    %89 = vector.multi_reduction <add>, %88, %cst_72 [0] : vector<16x1xf32> to vector<1xf32>
    %90 = vector.shape_cast %89 : vector<1xf32> to vector<1x1xf32>
    %91 = arith.addf %0, %90 : vector<1x1xf32>
    %c1_73 = arith.constant 1 : index
    %c0_74 = arith.constant 0 : index
    %c0_75 = arith.constant 0 : index
    %92 = vector.load %arg5[%c1_73, %c0_74, %c0_75] : memref<2x16x16xi32, #tpu.memory_space<vmem>>, vector<1x16x16xi32>
    %93 = vector.shape_cast %92 : vector<1x16x16xi32> to vector<16x16xi32>
    %c0_76 = arith.constant 0 : index
    %c0_77 = arith.constant 0 : index
    %94 = memref.load %arg1[%c0_76, %c0_77] : memref<2x4xf32, #tpu.memory_space<smem>>
    %c1_78 = arith.constant 1 : index
    %c0_79 = arith.constant 0 : index
    %c0_80 = arith.constant 0 : index
    %c0_81 = arith.constant 0 : index
    %95 = vector.load %arg0[%c1_78, %c0_79, %c0_80, %c0_81] : memref<2x4x8x8xf32, #tpu.memory_space<vmem>>, vector<1x1x8x8xf32>
    %96 = vector.shape_cast %95 : vector<1x1x8x8xf32> to vector<8x8xf32>
    %97 = vector.broadcast %94 : f32 to vector<8x8xf32>
    %98 = arith.mulf %97, %96 : vector<8x8xf32>
    %c0_82 = arith.constant 0 : index
    %c1_83 = arith.constant 1 : index
    %99 = memref.load %arg1[%c0_82, %c1_83] : memref<2x4xf32, #tpu.memory_space<smem>>
    %c1_84 = arith.constant 1 : index
    %c1_85 = arith.constant 1 : index
    %c0_86 = arith.constant 0 : index
    %c0_87 = arith.constant 0 : index
    %100 = vector.load %arg0[%c1_84, %c1_85, %c0_86, %c0_87] : memref<2x4x8x8xf32, #tpu.memory_space<vmem>>, vector<1x1x8x8xf32>
    %101 = vector.shape_cast %100 : vector<1x1x8x8xf32> to vector<8x8xf32>
    %102 = vector.broadcast %99 : f32 to vector<8x8xf32>
    %103 = arith.mulf %102, %101 : vector<8x8xf32>
    %104 = arith.addf %98, %103 : vector<8x8xf32>
    %c0_88 = arith.constant 0 : index
    %c2_89 = arith.constant 2 : index
    %105 = memref.load %arg1[%c0_88, %c2_89] : memref<2x4xf32, #tpu.memory_space<smem>>
    %c1_90 = arith.constant 1 : index
    %c2_91 = arith.constant 2 : index
    %c0_92 = arith.constant 0 : index
    %c0_93 = arith.constant 0 : index
    %106 = vector.load %arg0[%c1_90, %c2_91, %c0_92, %c0_93] : memref<2x4x8x8xf32, #tpu.memory_space<vmem>>, vector<1x1x8x8xf32>
    %107 = vector.shape_cast %106 : vector<1x1x8x8xf32> to vector<8x8xf32>
    %108 = vector.broadcast %105 : f32 to vector<8x8xf32>
    %109 = arith.mulf %108, %107 : vector<8x8xf32>
    %110 = arith.addf %104, %109 : vector<8x8xf32>
    %c0_94 = arith.constant 0 : index
    %c3_95 = arith.constant 3 : index
    %111 = memref.load %arg1[%c0_94, %c3_95] : memref<2x4xf32, #tpu.memory_space<smem>>
    %c1_96 = arith.constant 1 : index
    %c3_97 = arith.constant 3 : index
    %c0_98 = arith.constant 0 : index
    %c0_99 = arith.constant 0 : index
    %112 = vector.load %arg0[%c1_96, %c3_97, %c0_98, %c0_99] : memref<2x4x8x8xf32, #tpu.memory_space<vmem>>, vector<1x1x8x8xf32>
    %113 = vector.shape_cast %112 : vector<1x1x8x8xf32> to vector<8x8xf32>
    %114 = vector.broadcast %111 : f32 to vector<8x8xf32>
    %115 = arith.mulf %114, %113 : vector<8x8xf32>
    %116 = arith.addf %110, %115 : vector<8x8xf32>
    %c0_100 = arith.constant 0 : index
    %c0_101 = arith.constant 0 : index
    %117 = vector.load %arg3[%c0_100, %c0_101] : memref<16x8xf32, #tpu.memory_space<vmem>>, vector<16x8xf32>
    %cst_102 = arith.constant dense<0.000000e+00> : vector<16x8xf32>
    %118 = tpu.matmul %117, %116, %cst_102 {dimension_numbers = #tpu.dot_dimension_numbers<[1], [0], [0], [1], [0, 0, 1, 1], [], []>} : vector<16x8xf32>, vector<8x8xf32>, vector<16x8xf32> -> vector<16x8xf32>
    %c0_103 = arith.constant 0 : index
    %c0_104 = arith.constant 0 : index
    %119 = vector.load %arg4[%c0_103, %c0_104] : memref<8x16xf32, #tpu.memory_space<vmem>>, vector<8x16xf32>
    %cst_105 = arith.constant dense<0.000000e+00> : vector<16x16xf32>
    %120 = tpu.matmul %118, %119, %cst_105 {dimension_numbers = #tpu.dot_dimension_numbers<[1], [0], [0], [1], [0, 0, 1, 1], [], []>} : vector<16x8xf32>, vector<8x16xf32>, vector<16x16xf32> -> vector<16x16xf32>
    %c0_106 = arith.constant 0 : index
    %121 = memref.load %arg2[%c0_106] : memref<2xf32, #tpu.memory_space<smem>>
    %122 = vector.broadcast %121 : f32 to vector<16x16xf32>
    %123 = arith.addf %120, %122 : vector<16x16xf32>
    %c1_107 = arith.constant 1 : index
    %c0_108 = arith.constant 0 : index
    %c0_109 = arith.constant 0 : index
    %c0_110 = arith.constant 0 : index
    %124 = vector.load %arg7[%c1_107, %c0_108, %c0_109, %c0_110] : memref<2x2x16x16xf32, #tpu.memory_space<vmem>>, vector<1x1x16x16xf32>
    %125 = vector.shape_cast %124 : vector<1x1x16x16xf32> to vector<16x16xf32>
    %126 = vector.shape_cast %123 : vector<16x16xf32> to vector<1x1x16x16xf32>
    tpu.vector_store %arg7[%c1_107, %c0_108, %c0_109, %c0_110], %126 {strides = array<i32>} : memref<2x2x16x16xf32, #tpu.memory_space<vmem>>, vector<1x1x16x16xf32>,
    %c1_111 = arith.constant 1 : index
    %c0_112 = arith.constant 0 : index
    %127 = memref.load %arg1[%c1_111, %c0_112] : memref<2x4xf32, #tpu.memory_space<smem>>
    %c1_113 = arith.constant 1 : index
    %c0_114 = arith.constant 0 : index
    %c0_115 = arith.constant 0 : index
    %c0_116 = arith.constant 0 : index
    %128 = vector.load %arg0[%c1_113, %c0_114, %c0_115, %c0_116] : memref<2x4x8x8xf32, #tpu.memory_space<vmem>>, vector<1x1x8x8xf32>
    %129 = vector.shape_cast %128 : vector<1x1x8x8xf32> to vector<8x8xf32>
    %130 = vector.broadcast %127 : f32 to vector<8x8xf32>
    %131 = arith.mulf %130, %129 : vector<8x8xf32>
    %c1_117 = arith.constant 1 : index
    %c1_118 = arith.constant 1 : index
    %132 = memref.load %arg1[%c1_117, %c1_118] : memref<2x4xf32, #tpu.memory_space<smem>>
    %c1_119 = arith.constant 1 : index
    %c1_120 = arith.constant 1 : index
    %c0_121 = arith.constant 0 : index
    %c0_122 = arith.constant 0 : index
    %133 = vector.load %arg0[%c1_119, %c1_120, %c0_121, %c0_122] : memref<2x4x8x8xf32, #tpu.memory_space<vmem>>, vector<1x1x8x8xf32>
    %134 = vector.shape_cast %133 : vector<1x1x8x8xf32> to vector<8x8xf32>
    %135 = vector.broadcast %132 : f32 to vector<8x8xf32>
    %136 = arith.mulf %135, %134 : vector<8x8xf32>
    %137 = arith.addf %131, %136 : vector<8x8xf32>
    %c1_123 = arith.constant 1 : index
    %c2_124 = arith.constant 2 : index
    %138 = memref.load %arg1[%c1_123, %c2_124] : memref<2x4xf32, #tpu.memory_space<smem>>
    %c1_125 = arith.constant 1 : index
    %c2_126 = arith.constant 2 : index
    %c0_127 = arith.constant 0 : index
    %c0_128 = arith.constant 0 : index
    %139 = vector.load %arg0[%c1_125, %c2_126, %c0_127, %c0_128] : memref<2x4x8x8xf32, #tpu.memory_space<vmem>>, vector<1x1x8x8xf32>
    %140 = vector.shape_cast %139 : vector<1x1x8x8xf32> to vector<8x8xf32>
    %141 = vector.broadcast %138 : f32 to vector<8x8xf32>
    %142 = arith.mulf %141, %140 : vector<8x8xf32>
    %143 = arith.addf %137, %142 : vector<8x8xf32>
    %c1_129 = arith.constant 1 : index
    %c3_130 = arith.constant 3 : index
    %144 = memref.load %arg1[%c1_129, %c3_130] : memref<2x4xf32, #tpu.memory_space<smem>>
    %c1_131 = arith.constant 1 : index
    %c3_132 = arith.constant 3 : index
    %c0_133 = arith.constant 0 : index
    %c0_134 = arith.constant 0 : index
    %145 = vector.load %arg0[%c1_131, %c3_132, %c0_133, %c0_134] : memref<2x4x8x8xf32, #tpu.memory_space<vmem>>, vector<1x1x8x8xf32>
    %146 = vector.shape_cast %145 : vector<1x1x8x8xf32> to vector<8x8xf32>
    %147 = vector.broadcast %144 : f32 to vector<8x8xf32>
    %148 = arith.mulf %147, %146 : vector<8x8xf32>
    %149 = arith.addf %143, %148 : vector<8x8xf32>
    %c0_135 = arith.constant 0 : index
    %c0_136 = arith.constant 0 : index
    %150 = vector.load %arg3[%c0_135, %c0_136] : memref<16x8xf32, #tpu.memory_space<vmem>>, vector<16x8xf32>
    %cst_137 = arith.constant dense<0.000000e+00> : vector<16x8xf32>
    %151 = tpu.matmul %150, %149, %cst_137 {dimension_numbers = #tpu.dot_dimension_numbers<[1], [0], [0], [1], [0, 0, 1, 1], [], []>} : vector<16x8xf32>, vector<8x8xf32>, vector<16x8xf32> -> vector<16x8xf32>
    %c0_138 = arith.constant 0 : index
    %c0_139 = arith.constant 0 : index
    %152 = vector.load %arg4[%c0_138, %c0_139] : memref<8x16xf32, #tpu.memory_space<vmem>>, vector<8x16xf32>
    %cst_140 = arith.constant dense<0.000000e+00> : vector<16x16xf32>
    %153 = tpu.matmul %151, %152, %cst_140 {dimension_numbers = #tpu.dot_dimension_numbers<[1], [0], [0], [1], [0, 0, 1, 1], [], []>} : vector<16x8xf32>, vector<8x16xf32>, vector<16x16xf32> -> vector<16x16xf32>
    %c1_141 = arith.constant 1 : index
    %154 = memref.load %arg2[%c1_141] : memref<2xf32, #tpu.memory_space<smem>>
    %155 = vector.broadcast %154 : f32 to vector<16x16xf32>
    %156 = arith.addf %153, %155 : vector<16x16xf32>
    %c1_142 = arith.constant 1 : index
    %c1_143 = arith.constant 1 : index
    %c0_144 = arith.constant 0 : index
    %c0_145 = arith.constant 0 : index
    %157 = vector.load %arg7[%c1_142, %c1_143, %c0_144, %c0_145] : memref<2x2x16x16xf32, #tpu.memory_space<vmem>>, vector<1x1x16x16xf32>
    %158 = vector.shape_cast %157 : vector<1x1x16x16xf32> to vector<16x16xf32>
    %159 = vector.shape_cast %156 : vector<16x16xf32> to vector<1x1x16x16xf32>
    tpu.vector_store %arg7[%c1_142, %c1_143, %c0_144, %c0_145], %159 {strides = array<i32>} : memref<2x2x16x16xf32, #tpu.memory_space<vmem>>, vector<1x1x16x16xf32>,
    %160 = arith.maximumf %123, %156 : vector<16x16xf32>
    %161 = arith.subf %123, %160 : vector<16x16xf32>
    %162 = math.exp %161 : vector<16x16xf32>
    %163 = arith.subf %156, %160 : vector<16x16xf32>
    %164 = math.exp %163 : vector<16x16xf32>
    %165 = arith.addf %162, %164 : vector<16x16xf32>
    %166 = math.log %165 : vector<16x16xf32>
    %167 = arith.addf %166, %160 : vector<16x16xf32>
    %c0_i32_146 = arith.constant 0 : i32
    %168 = vector.broadcast %c0_i32_146 : i32 to vector<16x16xi32>
    %169 = arith.cmpi eq, %93, %168 : vector<16x16xi32>
    %cst_147 = arith.constant 0.000000e+00 : f32
    %170 = vector.broadcast %cst_147 : f32 to vector<16x16xf32>
    %171 = arith.select %169, %123, %170 : vector<16x16xi1>, vector<16x16xf32>
    %c1_i32_148 = arith.constant 1 : i32
    %172 = vector.broadcast %c1_i32_148 : i32 to vector<16x16xi32>
    %173 = arith.cmpi eq, %93, %172 : vector<16x16xi32>
    %cst_149 = arith.constant 0.000000e+00 : f32
    %174 = vector.broadcast %cst_149 : f32 to vector<16x16xf32>
    %175 = arith.select %173, %156, %174 : vector<16x16xi1>, vector<16x16xf32>
    %176 = arith.addf %171, %175 : vector<16x16xf32>
    %177 = arith.subf %167, %176 : vector<16x16xf32>
    %cst_150 = arith.constant dense<0.000000e+00> : vector<16xf32>
    %178 = vector.multi_reduction <add>, %177, %cst_150 [1] : vector<16x16xf32> to vector<16xf32>
    %179 = vector.shape_cast %178 : vector<16xf32> to vector<16x1xf32>
    %cst_151 = arith.constant dense<0.000000e+00> : vector<1xf32>
    %180 = vector.multi_reduction <add>, %179, %cst_151 [0] : vector<16x1xf32> to vector<1xf32>
    %181 = vector.shape_cast %180 : vector<1xf32> to vector<1x1xf32>
    %182 = arith.addf %91, %181 : vector<1x1xf32>
    %c0_152 = arith.constant 0 : index
    %183 = memref.load %arg6[%c0_152] : memref<1xf32, #tpu.memory_space<smem>>
    %cst_153 = arith.constant 0.001953125 : f32
    %184 = arith.mulf %183, %cst_153 : f32
    %185 = vector.broadcast %184 : f32 to vector<1x1xf32>
    %186 = arith.mulf %182, %185 : vector<1x1xf32>
    %c0_154 = arith.constant 0 : index
    %c0_155 = arith.constant 0 : index
    %187 = vector.load %arg8[%c0_154, %c0_155] : memref<1x1xf32, #tpu.memory_space<vmem>>, vector<1x1xf32>
    tpu.vector_store %arg8[%c0_154, %c0_155], %186 {strides = array<i32>} : memref<1x1xf32, #tpu.memory_space<vmem>>, vector<1x1xf32>,
    return
  }
}

</mosaic_0001>

<bundles_post_ra>
// kernel: tpu_custom_call.1
= control target key start
LH: loop header
LB: loop body
LE: loop exit
PB: predicated region body
PF: predicated region fallthrough
CT: control target
= control target key end

     0   :  { %15 = vsyncpa [#allocation4], 0  ;;  %s1442_s0 = inlined_call_operand.hbm [shape: f32[2,4,8,8], index: 0, kind: input, shape index: {}]   ;;  %s1443_s1 = inlined_call_operand.vmem [shape: f32[2,4], index: 1, kind: input, shape index: {}]   ;;  %s1444_s2 = inlined_call_operand.vmem [shape: f32[2], index: 2, kind: input, shape index: {}]   ;;  %s1445_s3 = inlined_call_operand.vmem [shape: f32[16,8], index: 3, kind: input, shape index: {}]   ;;  %s1446_s4 = inlined_call_operand.hbm [shape: f32[8,16], index: 4, kind: input, shape index: {}]   ;;  %s1447_s5 = inlined_call_operand.vmem [shape: s32[2,16,16], index: 5, kind: input, shape index: {}]   ;;  %s1448_s6 = inlined_call_operand.<no memory space> [shape: f32[1], index: 6, kind: input, shape index: {}]   ;;  %s1449_s7 = inlined_call_operand.hbm [shape: f32[2,2,16,16], index: 7, kind: output, shape index: {0}]   ;;  %s1450_s8 = inlined_call_operand.hbm [shape: f32[1,1], index: 8, kind: output, shape index: {1}]  }
   0x1   :  { %16 = vsyncpa [#allocation6], 0 }
   0x2   :  { %17 = vsyncpa [#allocation9], 0 }
   0x3   :  { %18 = vsyncpa [#allocation11], 0 }
   0x4   :  { %19 = vsyncpa [#allocation5], 0 }
   0x5   :  { %20 = vsyncpa [#allocation14], 0  ;;  %s1233_s27 = smov [#allocation3]   ;;  %s39_s9 = sshll.u32 %s1443_s1, 4  ;;  %s40_s9 = int_to_ptr.vmem [resolvable:$true] %s39_s9 }
   0x6   :  { %s26_s28 = sshll.u32 %s1233_s27, 4  ;;  %s27_s28 = int_to_ptr.vmem [resolvable:$true] %s26_s28 }
   0x7   :  { %s1125_s10 = scalar_lea.vmem %s27_s28, 1024  ;;  %p1130_p1 = scmp.lt.s32.totalorder %s27_s28, %s27_s28 }
   0x8   :  { %p1126_p0 = scmp.ne.s32.totalorder %s27_s28, %s1125_s10  ;;  %p1131_p2 = scmp.lt.s32.totalorder %s1125_s10, %s1125_s10 }
   0xa   :  { %p1132_p3 = por %p1131_p2, %p1130_p1 }
   0xc   :  { %p1133_p4 = pnand %p1132_p3, %p1126_p0 }
   0xe   :  { %1136 = shalt.err (!%p1133_p4)
}
   0xf   :  { %s1234_s11 = smov 128   ;;  %s1235_s12 = smov 8  }
  0x10   :  { %32 = dma.hbm_to_vmem [thread:$0]  %s1442_s0, 1024, %s27_s28, [#allocation4], %s1234_s11, %s1234_s11, %s1235_s12  }
  0x11   :  { %s1137_s15 = scalar_lea.vmem %s40_s9, 32  ;;  %p1142_p6 = scmp.lt.s32.totalorder %s40_s9, %s40_s9 }
  0x12   :  { %p1138_p5 = scmp.ne.s32.totalorder %s40_s9, %s1137_s15  ;;  %p1143_p7 = scmp.lt.s32.totalorder %s1137_s15, %s1137_s15 }
  0x14   :  { %p1144_p8 = por %p1143_p7, %p1142_p6 }
  0x16   :  { %p1145_p9 = pnand %p1144_p8, %p1138_p5 }
  0x18   :  { %1148 = shalt.err (!%p1145_p9)
}
  0x19   :  { %s1236_s1 = smov [#allocation7]   ;;  %s49_s18 = sshll.u32 %s1444_s2, 4  ;;  %s50_s18 = int_to_ptr.vmem [resolvable:$true] %s49_s18 }
  0x1a   :  { %42 = dma.vmem_to_smem %s40_s9, 32, %s1236_s1, [#allocation6]  }
  0x1b   :  { %s1149_s19 = scalar_lea.vmem %s50_s18, 16  ;;  %p1154_p11 = scmp.lt.s32.totalorder %s50_s18, %s50_s18 }
  0x1c   :  { %p1150_p10 = scmp.ne.s32.totalorder %s50_s18, %s1149_s19  ;;  %p1155_p12 = scmp.lt.s32.totalorder %s1149_s19, %s1149_s19 }
  0x1e   :  { %p1156_p13 = por %p1155_p12, %p1154_p11 }
  0x20   :  { %p1157_p0 = pnand %p1156_p13, %p1150_p10 }
  0x22   :  { %1160 = shalt.err (!%p1157_p0)
}
  0x23   :  { %s1237_s0 = smov [#allocation8]   ;;  %s1238_s20 = smov [#allocation10]  }
  0x24   :  { %52 = dma.vmem_to_smem %s50_s18, 16, %s1237_s0, [#allocation9]  }
  0x25   :  { %s61_s21 = sshll.u32 %s1238_s20, 4  ;;  %s62_s21 = int_to_ptr.vmem [resolvable:$true] %s61_s21 }
  0x26   :  { %s1169_s22 = scalar_lea.vmem %s62_s21, 128  ;;  %p1174_p2 = scmp.lt.s32.totalorder %s62_s21, %s62_s21 }
  0x27   :  { %p1170_p1 = scmp.ne.s32.totalorder %s62_s21, %s1169_s22  ;;  %p1175_p3 = scmp.lt.s32.totalorder %s1169_s22, %s1169_s22 }
  0x29   :  { %p1176_p4 = por %p1175_p3, %p1174_p2 }
  0x2b   :  { %p1177_p5 = pnand %p1176_p4, %p1170_p1 }
  0x2d   :  { %1180 = shalt.err (!%p1177_p5)
}
  0x2e   :  { %64 = dma.hbm_to_vmem [thread:$0]  %s1446_s4, 128, %s62_s21, [#allocation11]  }
  0x2f   :  { %1221 = dma.done.wait [#allocation4], 1024  }
  0x30   :  { %1222 = vsyncadd [#allocation4], 4294966272 }
  0x31   :  { %1223 = dma.done.wait [#allocation6], 32  }
  0x32   :  { %1224 = vsyncadd [#allocation6], 4294967264 }
  0x33   :  { %1225 = dma.done.wait [#allocation9], 16  }
  0x34   :  { %1226 = vsyncadd [#allocation9], 4294967280 }
  0x35   :  { %1227 = dma.done.wait [#allocation11], 128  }
  0x36   :  { %1228 = vsyncadd [#allocation11], 4294967168 }
  0x37   :  { %81 = sfence }
  0x38   :  { %s84_s24 = sld [smem:[#allocation7]]  ;;  %vm108_vm0 = vcmask 64512   ;;  %v1304_v0 = vld [vmem:[%s1445_s3] sm:$0xff]  ;;  %v90_v3 = vld [vmem:[#allocation3 + $0x8] sm:$0xff]  ;;  %v96_v6 = vld [vmem:[#allocation3 + $0x10] sm:$0xff]  ;;  %vm274_vm1 = vcmask 130048  }
  0x39   :  { %s987_s25 = sld [smem:[#allocation7 + $0x1]]  ;;  %1047 = vmatprep.mubr.msk.f32.mxu0 %vm108_vm0, %v1304_v0  ;;  %v85_v1 = vld [vmem:[#allocation3] sm:$0xff]  ;;  %v524_v4 = vld [vmem:[#allocation3 + $0x28] sm:$0xff]  ;;  %v530_v7 = vld [vmem:[#allocation3 + $0x30] sm:$0xff] }
  0x3a   :  { %s988_s28 = sld [smem:[#allocation7 + $0x2]]  ;;  %v519_v2 = vld [vmem:[#allocation3 + $0x20] sm:$0xff]  ;;  %v102_v10 = vld [vmem:[#allocation3 + $0x18] sm:$0xff]  ;;  %v107_v38 = vld [vmem:[%s1445_s3 + $0x8] sm:$0xff] }
  0x3b   :  { %s1308_s4 = sld [smem:[#allocation7 + $0x3]]  ;;  %v536_v18 = vld [vmem:[#allocation3 + $0x38] sm:$0xff]  ;;  %v190_v46 = vld [vmem:[#allocation10] sm:$0xff] }
  0x3c   :  { %s994_s29 = sld [smem:[#allocation7 + $0x80]]  ;;  %1050 = vmatprep.subr.mxu1 %v190_v46 }
  0x3d   :  { %s1310_s30 = sld [smem:[#allocation7 + $0x81]]  ;;  %1051 = vmatpush3.msra.mxu1 %v190_v46 }
  0x3e   :  { %v86_v5 = vstv %s84_s24  ;;  %s996_s9 = sld [smem:[#allocation7 + $0x82]]  ;;  %1060 = vmatprep.subr.mxu1 %v190_v46 }
  0x3f   :  { %v87_v8 = vmul.f32 %v86_v5, %v85_v1  ;;  %v91_v9 = vstv %s987_s25  ;;  %s1312_s10 = sld [smem:[#allocation7 + $0x83]]  ;;  %v521_v11 = vmul.f32 %v519_v2, %v86_v5 }
  0x40   :  { %v92_v12 = vmul.f32 %v91_v9, %v90_v3  ;;  %v97_v13 = vstv %s988_s28  ;;  %v526_v14 = vmul.f32 %v524_v4, %v91_v9  ;;  %s191_s3 = sld [smem:[#allocation8]] }
  0x41   :  { %v98_v15 = vmul.f32 %v97_v13, %v96_v6  ;;  %v103_v16 = vstv %s1308_s4  ;;  %v532_v17 = vmul.f32 %v530_v7, %v97_v13  ;;  %s1000_s15 = sld [smem:[#allocation8 + $0x1]] }
  0x42   :  { %v93_v19 = vadd.f32 %v92_v12, %v87_v8  ;;  %v104_v20 = vmul.f32 %v103_v16, %v102_v10  ;;  %v279_v21 = vstv %s994_s29  ;;  %v527_v22 = vadd.f32 %v526_v14, %v521_v11 }
  0x43   :  { %v280_v23 = vmul.f32 %v279_v21, %v85_v1  ;;  %v283_v24 = vstv %s1310_s30  ;;  %v713_v25 = vmul.f32 %v519_v2, %v279_v21  ;;  %v538_v29 = vmul.f32 %v536_v18, %v103_v16 }
  0x44   :  { %v99_v26 = vadd.f32 %v98_v15, %v93_v19  ;;  %v284_v27 = vmul.f32 %v283_v24, %v90_v3  ;;  %v288_v28 = vstv %s996_s9  ;;  %v717_v32 = vmul.f32 %v524_v4, %v283_v24 }
  0x45   :  { %v289_v30 = vmul.f32 %v288_v28, %v96_v6  ;;  %v293_v31 = vstv %s1312_s10  ;;  %v722_v33 = vmul.f32 %v530_v7, %v288_v28  ;;  %v533_v37 = vadd.f32 %v532_v17, %v527_v22 }
  0x46   :  { %v105_v34 = vadd.f32 %v104_v20, %v99_v26  ;;  %v285_v35 = vadd.f32 %v284_v27, %v280_v23  ;;  %v294_v36 = vmul.f32 %v293_v31, %v102_v10  ;;  %v718_v39 = vadd.f32 %v717_v32, %v713_v25 }
  0x47   :  { %v727_v41 = vmul.f32 %v536_v18, %v293_v31  ;;  %v539_v44 = vadd.f32 %v538_v29, %v533_v37  ;;  %v192_v55 = vstv %s191_s3  ;;  %v381_v59 = vstv %s1000_s15 }
  0x48   :  { %1045 = vmatprep.subr.mxu0 %v105_v34  ;;  %v290_v40 = vadd.f32 %v289_v30, %v285_v35  ;;  %v723_v42 = vadd.f32 %v722_v33, %v718_v39 }
  0x49   :  { %1046 = vmatpush3.msra.mxu0 %v105_v34 }
  0x4a   :  { %1048 = vmatmul.mubr.msk.f32.vlgmr.msra.gmra.mxu0 %vm108_vm0, %v107_v38  ;;  %v295_v43 = vadd.f32 %v294_v36, %v290_v40  ;;  %v728_v45 = vadd.f32 %v727_v41, %v723_v42  ;;  %v82_v41 = vld [vmem:[%s1447_s5] sm:$0xff] }
  0x4b   :  { %1057 = vmatprep.mubr.msk.f32.mxu0 %vm108_vm0, %v1304_v0  ;;  %vm492_vm2 = vcmp.eq.s32.totalorder %v82_v41, 1  ;;  %vm488_vm3 = vcmp.eq.s32.totalorder %v82_v41, 0 }
  0x4c   :  { %1055 = vmatprep.subr.mxu0 %v295_v43 }
  0x4d   :  { %1056 = vmatpush3.msra.mxu0 %v295_v43  ;;  %v83_v43 = vld [vmem:[%s1447_s5 + $0x8] sm:$0xff] }
  0x4e   :  { %1058 = vmatmul.mubr.msk.f32.vlgmr.msra.gmra.mxu0 %vm108_vm0, %v107_v38  ;;  %1065 = vmatprep.subr.mxu0 %v539_v44  ;;  %vm493_vm4 = vcmp.eq.s32.totalorder %v83_v43, 1  ;;  %vm489_vm5 = vcmp.eq.s32.totalorder %v83_v43, 0 }
  0x4f   :  { %1066 = vmatpush3.msra.mxu0 %v539_v44  ;;  %1067 = vmatprep.mubr.msk.f32.mxu0 %vm108_vm0, %v1304_v0 }
  0x50   :  { %1075 = vmatprep.subr.mxu0 %v728_v45 }
  0x52   :  { %1068 = vmatmul.mubr.msk.f32.vlgmr.msra.gmra.mxu0 %vm108_vm0, %v107_v38 }
  0x53   :  { %1076 = vmatpush3.msra.mxu0 %v728_v45  ;;  %1077 = vmatprep.mubr.msk.f32.mxu0 %vm108_vm0, %v1304_v0 }
  0x56   :  { %1078 = vmatmul.mubr.msk.f32.vlgmr.msra.gmra.mxu0 %vm108_vm0, %v107_v38 }
 0x10a   :  { %v1049_v47 = vpop.f32.mrf.mxu0 }
 0x10c   :  { %v181_v48 = vpop.f32.mrf.mxu0 }
 0x10d   :  { %1052 = vmatprep.mubr.msk.f32.mxu1 %vm108_vm0, %v181_v48 }
 0x10e   :  { %1053 = vmatmul.mubr.msk.f32.vlgmr.msra.gmra.mxu1 %vm108_vm0, %v1049_v47  ;;  %v1059_v49 = vpop.f32.mrf.mxu0 }
 0x10f   :  { %1061 = vmatpush3.msra.mxu1 %v190_v46 }
 0x110   :  { %v370_v50 = vpop.f32.mrf.mxu0  ;;  %1070 = vmatprep.subr.mxu1 %v190_v46 }
 0x111   :  { %1062 = vmatprep.mubr.msk.f32.mxu1 %vm108_vm0, %v370_v50 }
 0x112   :  { %1063 = vmatmul.mubr.msk.f32.vlgmr.msra.gmra.mxu1 %vm108_vm0, %v1059_v49  ;;  %v1069_v51 = vpop.f32.mrf.mxu0 }
 0x113   :  { %1071 = vmatpush3.msra.mxu1 %v190_v46 }
 0x114   :  { %v614_v52 = vpop.f32.mrf.mxu0  ;;  %1080 = vmatprep.subr.mxu1 %v190_v46 }
 0x115   :  { %1072 = vmatprep.mubr.msk.f32.mxu1 %vm108_vm0, %v614_v52 }
 0x116   :  { %1073 = vmatmul.mubr.msk.f32.vlgmr.msra.gmra.mxu1 %vm108_vm0, %v1069_v51  ;;  %v1079_v53 = vpop.f32.mrf.mxu0 }
 0x117   :  { %1081 = vmatpush3.msra.mxu1 %v190_v46 }
 0x118   :  { %v803_v54 = vpop.f32.mrf.mxu0 }
 0x119   :  { %1082 = vmatprep.mubr.msk.f32.mxu1 %vm108_vm0, %v803_v54 }
 0x11a   :  { %1083 = vmatmul.mubr.msk.f32.vlgmr.msra.gmra.mxu1 %vm108_vm0, %v1079_v53  ;;  %v1003_v53 = vld [vmem:[%s1447_s5 + $0x10] sm:$0xff] }
 0x11b   :  { %vm925_vm6 = vcmp.eq.s32.totalorder %v1003_v53, 1  ;;  %vm921_vm7 = vcmp.eq.s32.totalorder %v1003_v53, 0 }
 0x1ce   :  { %v1054_v56 = vpop.f32.mrf.mxu1 }
 0x1cf   :  { %v1338_v57 = vadd.f32 %v1054_v56, %v192_v55 }
 0x1d0   :  { %v265_v58 = vpop.f32.mrf.mxu1 }
 0x1d1   :  { %276 = vst.msk [vmem:[#allocation12 + $0x8] sm:$0xff] %vm274_vm1, %v1338_v57  ;;  %v1342_v60 = vadd.f32 %v265_v58, %v192_v55  ;;  %v491_v54 = vsel %vm489_vm5, %v1338_v57, 0.0 }
 0x1d2   :  { %v1064_v61 = vpop.f32.mrf.mxu1 }
 0x1d3   :  { %275 = vst.msk [vmem:[#allocation12] sm:$0xff] %vm274_vm1, %v1342_v60  ;;  %v1346_v62 = vadd.f32 %v1064_v61, %v381_v59  ;;  %v490_v48 = vsel %vm488_vm3, %v1342_v60, 0.0 }
 0x1d4   :  { %v454_v63 = vpop.f32.mrf.mxu1 }
 0x1d5   :  { %465 = vst.msk [vmem:[#allocation12 + $0x18] sm:$0xff] %vm274_vm1, %v1346_v62  ;;  %v1352_v0 = vmax.f32 %v1338_v57, %v1346_v62  ;;  %v1354_v1 = vadd.f32 %v454_v63, %v381_v59  ;;  %v495_v49 = vsel %vm493_vm4, %v1346_v62, 0.0 }
 0x1d6   :  { %v1074_v2 = vpop.f32.mrf.mxu1  ;;  %v497_v56 = vadd.f32 %v495_v49, %v491_v54 }
 0x1d7   :  { %v469_v3 = vsub.f32 %v1338_v57, %v1352_v0  ;;  %v475_v4 = vsub.f32 %v1346_v62, %v1352_v0  ;;  %464 = vst.msk [vmem:[#allocation12 + $0x10] sm:$0xff] %vm274_vm1, %v1354_v1  ;;  %v1362_v5 = vadd.f32 %v1074_v2, %v192_v55  ;;  %v1366_v6 = vmax.f32 %v1342_v60, %v1354_v1 }
 0x1d8   :  { %v698_v7 = vpop.f32.mrf.mxu1  ;;  %v494_v46 = vsel %vm492_vm2, %v1354_v1, 0.0 }
 0x1d9   :  { %v472_v8 = vmul.f32 1.442695, %v469_v3  ;;  %v478_v9 = vmul.f32 1.442695, %v475_v4  ;;  %709 = vst.msk [vmem:[#allocation12 + $0x28] sm:$0xff] %vm274_vm1, %v1362_v5  ;;  %v1370_v10 = vadd.f32 %v698_v7, %v192_v55  ;;  %v468_v11 = vsub.f32 %v1342_v60, %v1366_v6 }
 0x1da   :  { %v1084_v12 = vpop.f32.mrf.mxu1  ;;  %v474_v13 = vsub.f32 %v1354_v1, %v1366_v6  ;;  %v496_v51 = vadd.f32 %v494_v46, %v490_v48 }
 0x1db   :  { %1093 = vpow2.f32 %v472_v8  ;;  %708 = vst.msk [vmem:[#allocation12 + $0x20] sm:$0xff] %vm274_vm1, %v1370_v10  ;;  %v1378_v14 = vadd.f32 %v1084_v12, %v381_v59  ;;  %v470_v15 = vmul.f32 1.442695, %v468_v11  ;;  %v923_v57 = vsel %vm921_vm7, %v1370_v10, 0.0 }
 0x1dc   :  { %1095 = vpow2.f32 %v478_v9  ;;  %v887_v16 = vpop.f32.mrf.mxu1  ;;  %v476_v17 = vmul.f32 1.442695, %v474_v13 }
 0x1dd   :  { %898 = vst.msk [vmem:[#allocation12 + $0x38] sm:$0xff] %vm274_vm1, %v1378_v14  ;;  %v1384_v18 = vmax.f32 %v1362_v5, %v1378_v14  ;;  %v1386_v19 = vadd.f32 %v887_v16, %v381_v59  ;;  %1097 = vpow2.f32 %v470_v15  ;;  %v1004_v59 = vld [vmem:[%s1447_s5 + $0x18] sm:$0xff]  ;;  %s1239_s5 = smov [#allocation12]  }
 0x1de   :  { %1099 = vpow2.f32 %v476_v17  ;;  %vm926_vm8 = vcmp.eq.s32.totalorder %v1004_v59, 1  ;;  %vm922_vm9 = vcmp.eq.s32.totalorder %v1004_v59, 0  ;;  %s958_s22 = sshll.u32 %s1239_s5, 4  ;;  %s959_s22 = int_to_ptr.vmem [resolvable:$true] %s958_s22 }
 0x1df   :  { %v902_v20 = vsub.f32 %v1362_v5, %v1384_v18  ;;  %v908_v21 = vsub.f32 %v1378_v14, %v1384_v18  ;;  %897 = vst.msk [vmem:[#allocation12 + $0x30] sm:$0xff] %vm274_vm1, %v1386_v19  ;;  %v1396_v22 = vmax.f32 %v1370_v10, %v1386_v19  ;;  %v928_v2 = vsel %vm926_vm8, %v1378_v14, 0.0  ;;  %s1181_s2 = scalar_lea.vmem %s959_s22, 1024  ;;  %p1186_p7 = scmp.lt.s32.totalorder %s959_s22, %s959_s22 }
 0x1e0   :  { %v924_v8 = vsel %vm922_vm9, %v1362_v5, 0.0  ;;  %p1182_p6 = scmp.ne.s32.totalorder %s959_s22, %s1181_s2  ;;  %p1187_p8 = scmp.lt.s32.totalorder %s1181_s2, %s1181_s2 }
 0x1e1   :  { %v905_v23 = vmul.f32 1.442695, %v902_v20  ;;  %v911_v24 = vmul.f32 1.442695, %v908_v21  ;;  %v901_v25 = vsub.f32 %v1370_v10, %v1396_v22  ;;  %v907_v26 = vsub.f32 %v1386_v19, %v1396_v22 }
 0x1e2   :  { %v930_v11 = vadd.f32 %v928_v2, %v924_v8  ;;  %p1188_p9 = por %p1187_p8, %p1186_p7 }
 0x1e3   :  { %1101 = vpow2.f32 %v905_v23  ;;  %v903_v27 = vmul.f32 1.442695, %v901_v25  ;;  %v909_v28 = vmul.f32 1.442695, %v907_v26 }
 0x1e4   :  { %1103 = vpow2.f32 %v911_v24  ;;  %p1189_p10 = pnand %p1188_p9, %p1182_p6 }
 0x1e5   :  { %1105 = vpow2.f32 %v903_v27 }
 0x1e6   :  { %1107 = vpow2.f32 %v909_v28 }
 0x1e8   :  { %v1094_v29 = vpop.eup %1093 }
 0x1e9   :  { %v1096_v30 = vpop.eup %1095 }
 0x1ea   :  { %v1098_v31 = vpop.eup %1097  ;;  %v481_v32 = vadd.f32 %v1096_v30, %v1094_v29 }
 0x1eb   :  { %v1100_v33 = vpop.eup %1099 }
 0x1ec   :  { %v480_v34 = vadd.f32 %v1100_v33, %v1098_v31  ;;  %1109 = vlog2.f32 %v481_v32 }
 0x1ee   :  { %1111 = vlog2.f32 %v480_v34 }
 0x1f0   :  { %v1102_v35 = vpop.eup %1101 }
 0x1f1   :  { %v1104_v36 = vpop.eup %1103 }
 0x1f2   :  { %v1106_v37 = vpop.eup %1105  ;;  %v914_v38 = vadd.f32 %v1104_v36, %v1102_v35 }
 0x1f3   :  { %v1108_v39 = vpop.eup %1107 }
 0x1f4   :  { %v913_v40 = vadd.f32 %v1108_v39, %v1106_v37  ;;  %1113 = vlog2.f32 %v914_v38 }
 0x1f6   :  { %1115 = vlog2.f32 %v913_v40 }
 0x1f9   :  { %v1110_v42 = vpop.eup %1109 }
 0x1fa   :  { %v485_v44 = vmul.f32 0.6931472, %v1110_v42 }
 0x1fb   :  { %v1112_v45 = vpop.eup %1111 }
 0x1fc   :  { %v483_v47 = vmul.f32 0.6931472, %v1112_v45  ;;  %v487_v52 = vadd.f32 %v485_v44, %v1352_v0  ;;  %v927_v0 = vsel %vm925_vm6, %v1386_v19, 0.0 }
 0x1fe   :  { %v486_v50 = vadd.f32 %v483_v47, %v1366_v6  ;;  %v499_v61 = vsub.f32 %v487_v52, %v497_v56  ;;  %v929_v6 = vadd.f32 %v927_v0, %v923_v57 }
 0x200   :  { %v498_v55 = vsub.f32 %v486_v50, %v496_v51  ;;  %v503_v3 = vsel %vm274_vm1, %v499_v61, 0.0 }
 0x201   :  { %v1114_v58 = vpop.eup %1113 }
 0x202   :  { %v500_v60 = vsel %vm274_vm1, %v498_v55, 0.0  ;;  %v918_v62 = vmul.f32 0.6931472, %v1114_v58 }
 0x203   :  { %v1116_v63 = vpop.eup %1115  ;;  %501 = vadd.xlane.f32.xlu0 %v500_v60 }
 0x204   :  { %v916_v1 = vmul.f32 0.6931472, %v1116_v63  ;;  %v920_v7 = vadd.f32 %v918_v62, %v1384_v18 }
 0x206   :  { %v919_v4 = vadd.f32 %v916_v1, %v1396_v22  ;;  %v932_v13 = vsub.f32 %v920_v7, %v930_v11 }
 0x207   :  { %504 = vadd.xlane.f32.xlu0 %v503_v3 }
 0x208   :  { %v931_v9 = vsub.f32 %v919_v4, %v929_v6  ;;  %v936_v10 = vsel %vm274_vm1, %v932_v13, 0.0 }
 0x20a   :  { %v933_v12 = vsel %vm274_vm1, %v931_v9, 0.0 }
 0x20b   :  { %934 = vadd.xlane.f32.xlu1 %v933_v12 }
 0x20f   :  { %937 = vadd.xlane.f32.xlu1 %v936_v10 }
 0x210   :  { %1192 = shalt.err (!%p1189_p10)
}
 0x211   :  { %964 = dma.vmem_to_hbm [thread:$0]  %s959_s22, 1024, %s1449_s7, [#allocation5], %s1234_s11, %s1234_s11, %s1235_s12   ;;  %vm951_vm10 = vcmask 0  }
 0x212   :  { %s948_s27 = smul.f32 0.001953125, %s1448_s6  ;;  %s1240_s7 = smov [#allocation13]  }
 0x213   :  { %s971_s11 = sshll.u32 %s1240_s7, 4  ;;  %s972_s11 = int_to_ptr.vmem [resolvable:$true] %s971_s11 }
 0x214   :  { %v949_v31 = vstv %s948_s27  ;;  %s1201_s12 = scalar_lea.vmem %s972_s11, 16  ;;  %s1205_s28 = scalar_lea.vmem %s972_s11, 32 }
 0x215   :  { %p1202_p11 = scmp.ne.s32.totalorder %s972_s11, %s1201_s12  ;;  %p1206_p12 = scmp.lt.s32.totalorder %s972_s11, %s972_s11 }
 0x216   :  { %p1207_p13 = scmp.lt.s32.totalorder %s1205_s28, %s1201_s12 }
 0x218   :  { %p1208_p0 = por %p1207_p13, %p1206_p12 }
 0x21a   :  { %p1209_p1 = pnand %p1208_p0, %p1202_p11 }
 0x28c   :  { %v502_v5 = vpop.xlane.xlu0 %501 }
 0x290   :  { %v505_v14 = vpop.xlane.xlu0 %504 }
 0x291   :  { %v506_v15 = vadd.f32 %v505_v14, %v502_v5 }
 0x293   :  { %v507_v16 = vrot.slane %v506_v15, 4 }
 0x294   :  { %v935_v17 = vpop.xlane.xlu1 %934 }
 0x295   :  { %v508_v18 = vadd.f32 %v507_v16, %v506_v15 }
 0x297   :  { %v509_v20 = vrot.slane %v508_v18, 2 }
 0x298   :  { %v938_v19 = vpop.xlane.xlu1 %937 }
 0x299   :  { %v939_v21 = vadd.f32 %v938_v19, %v935_v17  ;;  %v510_v23 = vadd.f32 %v509_v20, %v508_v18 }
 0x29b   :  { %v940_v22 = vrot.slane %v939_v21, 4  ;;  %v511_v26 = vrot.slane %v510_v23, 1 }
 0x29d   :  { %v941_v24 = vadd.f32 %v940_v22, %v939_v21  ;;  %v512_v29 = vadd.f32 %v511_v26, %v510_v23 }
 0x29f   :  { %v942_v25 = vrot.slane %v941_v24, 2 }
 0x2a1   :  { %v943_v27 = vadd.f32 %v942_v25, %v941_v24 }
 0x2a3   :  { %v944_v28 = vrot.slane %v943_v27, 1 }
 0x2a5   :  { %v945_v30 = vadd.f32 %v944_v28, %v943_v27 }
 0x2a7   :  { %v946_v32 = vadd.f32 %v945_v30, %v512_v29 }
 0x2a9   :  { %v950_v33 = vmul.f32 %v949_v31, %v946_v32 }
 0x2ab   :  { %952 = vst.msk [vmem:[#allocation13] sm:$0x1] %vm951_vm10, %v950_v33 }
 0x2ac   :  { %1212 = shalt.err (!%p1209_p1)
}
 0x2ad   :  { %974 = dma.vmem_to_hbm [thread:$0]  %s972_s11, 16, %s1450_s8, [#allocation14]  }
 0x2ae   :  { %1229 = dma.done.wait [#allocation5], 1024  }
 0x2af   :  { %1230 = vsyncadd [#allocation5], 4294966272 }
 0x2b0   :  { %1231 = dma.done.wait [#allocation14], 16  }
 0x2b1   :  { %1232 = vsyncadd [#allocation14], 4294967280 }
 0x2b2   :  { %981 = vsyncpa [#allocation4], 1 }
 0x2b3   :  { %982 = vsyncpa [#allocation11], 1 }
 0x2b4   :  { %983 = vsyncpa [#allocation5], 1 }
 0x2b5   :  { %984 = vsyncpa [#allocation14], 1 }
 0x2b6   :  { %985 = vsyncpa [#allocation6], 1 }
 0x2b7   :  { %986 = vsyncpa [#allocation9], 1 }

</bundles_post_ra>
